<compile_context>
chip_gen: v7x
topology: tpu7x:2x2x1
jax: 0.10.0
libtpu: 0.0.40
codegen_flags: <defaults>
</compile_context>

<pallas_src>
import jax
import jax.numpy as jnp
from jax.experimental import pallas as pl
from jax.experimental.pallas import tpu as pltpu


def _affine_kernel(x_ref, w_ref, o_ref):
    # x_ref: (rows, HW), w_ref: (rows, 1) -> lane-broadcast multiply.
    o_ref[...] = x_ref[...] * w_ref[...]


def _affine_bias_kernel(x_ref, w_ref, b_ref, o_ref):
    # x_ref: (rows, HW), w_ref/b_ref: (rows, 1) -> fused multiply-add.
    o_ref[...] = x_ref[...] * w_ref[...] + b_ref[...]


def _choose_row_tile(total_rows, hw, itemsize, target_bytes=4 << 20):
    """Pick a sublane-full row tile: a multiple of 8, or the whole row dim.

    Targets ~4 MiB per x block so the pipeline runs fat DMAs (>=85% of HBM
    roofline per measured v6e data) while 2x-in + 2x-out double buffering
    stays comfortably inside the default scoped VMEM on v5e/v6e/v7x.
    """
    rows = (target_bytes // (hw * itemsize)) // 8 * 8
    rows = max(8, int(rows))
    # If the whole array has fewer rows than one tile, use the full dim
    # (block == full array dim is always a legal block shape).
    return int(min(rows, total_rows))


def affine_layer(x, weight, bias=None):
    """Pallas implementation of AffineLayer.forward.

    x:      (N, C, H, W)
    weight: (1, C, 1, 1)
    bias:   (1, C, 1, 1) or None
    returns (N, C, H, W), same dtype as x
    """
    N, C, H, W = x.shape
    HW = H * W
    total_rows = N * C

    # Lane-dense, sublane-full 2D view: row r <-> (n, c) = (r // C, r % C).
    x_flat = x.reshape(total_rows, HW)
    # Per-row scale (tiny; tiled once in the wrapper, matches row<->channel map).
    w_rows = jnp.tile(weight.reshape(C, 1), (N, 1)).astype(x.dtype)

    rows = _choose_row_tile(total_rows, HW, x.dtype.itemsize)
    grid = (pl.cdiv(total_rows, rows),)

    x_spec = pl.BlockSpec((rows, HW), lambda i: (i, 0))
    p_spec = pl.BlockSpec((rows, 1), lambda i: (i, 0))
    out_spec = pl.BlockSpec((rows, HW), lambda i: (i, 0))
    out_shape = jax.ShapeDtypeStruct((total_rows, HW), x.dtype)
    cparams = pltpu.CompilerParams(dimension_semantics=("parallel",))

    if bias is not None:
        b_rows = jnp.tile(bias.reshape(C, 1), (N, 1)).astype(x.dtype)
        out = pl.pallas_call(
            _affine_bias_kernel,
            out_shape=out_shape,
            grid=grid,
            in_specs=[x_spec, p_spec, p_spec],
            out_specs=out_spec,
            compiler_params=cparams,
        )(x_flat, w_rows, b_rows)
    else:
        out = pl.pallas_call(
            _affine_kernel,
            out_shape=out_shape,
            grid=grid,
            in_specs=[x_spec, p_spec],
            out_specs=out_spec,
            compiler_params=cparams,
        )(x_flat, w_rows)

    return out.reshape(N, C, H, W)


if __name__ == "__main__":
    N, C, H, W = 2, 4, 16, 16

    key = jax.random.PRNGKey(0)
    kx, kw, kb = jax.random.split(key, 3)

    x = jax.random.normal(kx, (N, C, H, W), dtype=jnp.float32)

    # Module __init__ fills weight with 1 and bias with 0; keep the shapes but
    # use deterministic random values so the check is non-trivial.
    weight = jnp.ones((1, C, 1, 1), jnp.float32) + 0.1 * jax.random.normal(
        kw, (1, C, 1, 1), dtype=jnp.float32
    )
    bias = 0.1 * jax.random.normal(kb, (1, C, 1, 1), dtype=jnp.float32)

    # --- bias=True path ---
    out_b = affine_layer(x, weight, bias)
    out_b = jax.block_until_ready(out_b)
    ref_b = x * weight + bias
    assert out_b.shape == x.shape and out_b.dtype == x.dtype
    assert jnp.allclose(out_b, ref_b, atol=1e-6, rtol=1e-6)

    # --- bias=False path (default in the PyTorch module) ---
    out_nb = affine_layer(x, weight, None)
    out_nb = jax.block_until_ready(out_nb)
    ref_nb = x * weight
    assert out_nb.shape == x.shape and out_nb.dtype == x.dtype
    assert jnp.allclose(out_nb, ref_nb, atol=1e-6, rtol=1e-6)

    print("KERNEL_OK")
</pallas_src>

<mosaic_0001>
module attributes {stable_mosaic.version = 11 : i64} {
  func.func @_affine_bias_kernel(%arg0: i32, %arg1: memref<8x256xf32, #tpu.memory_space<vmem>>, %arg2: memref<8x1xf32, #tpu.memory_space<vmem>>, %arg3: memref<8x1xf32, #tpu.memory_space<vmem>>, %arg4: memref<8x256xf32, #tpu.memory_space<vmem>>) attributes {dimension_semantics = [#tpu.dimension_semantics<parallel>], iteration_bounds = array<i64: 1>, scalar_prefetch = 0 : i64, scratch_operands = 0 : i64, tpu.core_type = #tpu.core_type<tc>, window_params = [{transform_indices = @transform_0, window_bounds = array<i64: 8, 256>}, {transform_indices = @transform_1, window_bounds = array<i64: 8, 1>}, {transform_indices = @transform_2, window_bounds = array<i64: 8, 1>}, {transform_indices = @transform_3, window_bounds = array<i64: 8, 256>}]} {
    %c0 = arith.constant 0 : index
    %c0_0 = arith.constant 0 : index
    %0 = vector.load %arg1[%c0, %c0_0] : memref<8x256xf32, #tpu.memory_space<vmem>>, vector<8x256xf32>
    %c0_1 = arith.constant 0 : index
    %c0_2 = arith.constant 0 : index
    %1 = vector.load %arg2[%c0_1, %c0_2] : memref<8x1xf32, #tpu.memory_space<vmem>>, vector<8x1xf32>
    %2 = vector.broadcast %1 : vector<8x1xf32> to vector<8x256xf32>
    %3 = arith.mulf %0, %2 : vector<8x256xf32>
    %c0_3 = arith.constant 0 : index
    %c0_4 = arith.constant 0 : index
    %4 = vector.load %arg3[%c0_3, %c0_4] : memref<8x1xf32, #tpu.memory_space<vmem>>, vector<8x1xf32>
    %5 = vector.broadcast %4 : vector<8x1xf32> to vector<8x256xf32>
    %6 = arith.addf %3, %5 : vector<8x256xf32>
    %c0_5 = arith.constant 0 : index
    %c0_6 = arith.constant 0 : index
    %7 = vector.load %arg4[%c0_5, %c0_6] : memref<8x256xf32, #tpu.memory_space<vmem>>, vector<8x256xf32>
    tpu.vector_store %arg4[%c0_5, %c0_6], %6 {strides = array<i32>} : memref<8x256xf32, #tpu.memory_space<vmem>>, vector<8x256xf32>,
    return
  }
  func.func @transform_0(%arg0: i32) -> (i32, i32) {
    %c0_i32 = arith.constant 0 : i32
    %c0_i32_0 = arith.constant 0 : i32
    return %arg0, %c0_i32 : i32, i32
  }
  func.func @transform_1(%arg0: i32) -> (i32, i32) {
    %c0_i32 = arith.constant 0 : i32
    %c0_i32_0 = arith.constant 0 : i32
    return %arg0, %c0_i32 : i32, i32
  }
  func.func @transform_2(%arg0: i32) -> (i32, i32) {
    %c0_i32 = arith.constant 0 : i32
    %c0_i32_0 = arith.constant 0 : i32
    return %arg0, %c0_i32 : i32, i32
  }
  func.func @transform_3(%arg0: i32) -> (i32, i32) {
    %c0_i32 = arith.constant 0 : i32
    %c0_i32_0 = arith.constant 0 : i32
    return %arg0, %c0_i32 : i32, i32
  }
}

</mosaic_0001>

<bundles_post_ra>
// kernel: tpu_custom_call.1
= control target key start
LH: loop header
LB: loop body
LE: loop exit
PB: predicated region body
PF: predicated region fallthrough
CT: control target
= control target key end

     0   :  { %s122_s0 = inlined_call_operand.vmem [shape: f32[8,256], index: 0, kind: input, shape index: {}]   ;;  %s123_s1 = inlined_call_operand.vmem [shape: f32[8,1], index: 1, kind: input, shape index: {}]   ;;  %s124_s2 = inlined_call_operand.vmem [shape: f32[8,1], index: 2, kind: input, shape index: {}]   ;;  %s125_s3 = inlined_call_operand.hbm [shape: f32[8,256], index: 3, kind: output, shape index: {}]  }
   0x1   :  { %v17_v0 = vld [vmem:[%s123_s1] sm:$0xff] }
   0x2   :  { %8 = vsyncpa [#allocation3], 0  ;;  %v76_v1 = vmov 0   ;;  %v25_v2 = vld [vmem:[%s124_s2] sm:$0xff]  ;;  %v16_v5 = vld [vmem:[%s122_s0 + $0x8] sm:$0xff]  ;;  %s77_s20 = smov [#allocation2]  }
   0x3   :  { %51 = vset.pattern.permute.xlu0 %v76_v1  ;;  %v15_v4 = vld [vmem:[%s122_s0] sm:$0xff]  ;;  %s41_s1 = sshll.u32 %s77_s20, 4  ;;  %s42_s1 = int_to_ptr.vmem [resolvable:$true] %s41_s1 }
   0x4   :  { %20 = vperm.xlu0 %51, %v17_v0   ;;  %s52_s2 = scalar_lea.vmem %s42_s1, 256  ;;  %p57_p1 = scmp.lt.s32.totalorder %s42_s1, %s42_s1 }
   0x5   :  { %p53_p0 = scmp.ne.s32.totalorder %s42_s1, %s52_s2  ;;  %p58_p2 = scmp.lt.s32.totalorder %s52_s2, %s52_s2 }
   0x7   :  { %p59_p3 = por %p58_p2, %p57_p1 }
   0x8   :  { %28 = vperm.xlu0 %51, %v25_v2  }
   0x9   :  { %p60_p4 = pnand %p59_p3, %p53_p0 }
  0x83   :  { %v21_v3 = vpop.permute.xlu0 %20 }
  0x84   :  { %v23_v6 = vmul.f32 %v21_v3, %v15_v4  ;;  %v24_v7 = vmul.f32 %v21_v3, %v16_v5 }
  0x87   :  { %v29_v8 = vpop.permute.xlu0 %28 }
  0x88   :  { %v31_v9 = vadd.f32 %v29_v8, %v23_v6  ;;  %v32_v10 = vadd.f32 %v29_v8, %v24_v7 }
  0x8a   :  { %33 = vst [vmem:[#allocation2] sm:$0xff] %v31_v9  ;;  %34 = vst [vmem:[#allocation2 + $0x8] sm:$0xff] %v32_v10 }
  0x8b   :  { %63 = shalt.err (!%p60_p4)
}
  0x8c   :  { %s64_s0 = scalar_lea.hbm %s125_s3, 256 }
  0x8d   :  { %p65_p5 = scmp.ne.s32.totalorder %s125_s3, %s64_s0  ;;  %p68_p6 = scmp.lt.u32.totalorder %s64_s0, %s125_s3 }
  0x8f   :  { %p70_p7 = pnand %p68_p6, %p65_p5 }
  0x91   :  { %73 = shalt.err (!%p70_p7)
}
  0x92   :  { %44 = dma.vmem_to_hbm [thread:$0]  %s42_s1, 256, %s125_s3, [#allocation3]  }
  0x93   :  { %74 = dma.done.wait [#allocation3], 256  }
  0x94   :  { %75 = vsyncadd [#allocation3], 4294967040 }
  0x95   :  { %48 = vsyncpa [#allocation3], 1 }

</bundles_post_ra>
